<compile_context>
chip_gen: v7x
topology: tpu7x:2x2x1
jax: 0.10.0
libtpu: 0.0.40
codegen_flags: <defaults>
</compile_context>

<pallas_src>
import functools
import math

import jax
import jax.numpy as jnp
from jax import lax
from jax.experimental import pallas as pl
from jax.experimental.pallas import tpu as pltpu


def _flash_body(q_ref, k_ref, v_ref, mask_ref, o_ref,
                qs_sc, m_sc, l_sc, acc_sc, *, scale, kv_valid):
    """Flash-attention inner body. mask_ref may be None; kv_valid is the true
    (unpadded) kv length when the kv axis was padded, else None."""
    kv_idx = pl.program_id(2)

    @pl.when(kv_idx == 0)
    def _init():
        # Hoisted per-q-tile work: scale q once (fp32 math) and keep the bf16
        # MXU operand resident in VMEM for every kv step of this q tile.
        qs_sc[...] = (q_ref[0].astype(jnp.float32) * scale).astype(jnp.bfloat16)
        m_sc[...] = jnp.full(m_sc.shape, -jnp.inf, dtype=m_sc.dtype)
        l_sc[...] = jnp.zeros(l_sc.shape, dtype=l_sc.dtype)
        acc_sc[...] = jnp.zeros(acc_sc.shape, dtype=acc_sc.dtype)

    k = k_ref[0]  # (tk, D) bf16
    v = v_ref[0]  # (tk, D) bf16
    tk = k.shape[0]

    # QK^T on the native bf16 MXU path; contract last dims (no K transpose).
    s = lax.dot_general(
        qs_sc[...], k, (((1,), (1,)), ((), ())),
        preferred_element_type=jnp.float32)              # (tq, tk) fp32

    if mask_ref is not None:
        # Compare+select instead of convert/multiply/add on the score tile.
        # Reference semantics: x += mask * -10000.0 with a bool mask.
        s = jnp.where(mask_ref[0] != 0, s - 10000.0, s)

    if kv_valid is not None:
        # kv axis was padded to a tile multiple; suppress padded columns.
        col = kv_idx * tk + lax.broadcasted_iota(jnp.int32, s.shape, 1)
        s = jnp.where(col < kv_valid, s, -1e30)

    # Online (flash) softmax update; elementwise math stays fp32.
    m_prev = m_sc[...]                                   # (tq, 1)
    m_new = jnp.maximum(m_prev, jnp.max(s, axis=-1, keepdims=True))
    alpha = jnp.exp(m_prev - m_new)                      # (tq, 1)
    p = jnp.exp(s - m_new)                               # (tq, tk) fp32

    l_sc[...] = alpha * l_sc[...] + jnp.sum(p, axis=-1, keepdims=True)
    acc_sc[...] = alpha * acc_sc[...] + jnp.dot(
        p.astype(jnp.bfloat16), v, preferred_element_type=jnp.float32)
    m_sc[...] = m_new

    # TODO(synk): nn.Dropout on the softmax probabilities is identity in eval
    # mode; training-mode dropout is not implemented.
    # TODO(synk): scalar-prefetched block-mask metadata could skip uniform
    # (all-masked / all-unmasked) kv tiles for causal/padding masks.
    # TODO(synk): for deployed D < 128, packing heads/batches into the lane dim
    # would make the output store lane-dense; not done here (D is the spec's
    # hidden dim and the module is shape-generic).

    @pl.when(kv_idx == pl.num_programs(2) - 1)
    def _finalize():
        # Exact reciprocal: O(tq) per q tile, keeps parity with the reference.
        inv_l = pl.reciprocal(l_sc[...], approx=False)
        o_ref[0] = (acc_sc[...] * inv_l).astype(o_ref.dtype)


def _masked_kernel(q_ref, k_ref, v_ref, mask_ref, o_ref,
                   qs_sc, m_sc, l_sc, acc_sc, *, scale, kv_valid):
    _flash_body(q_ref, k_ref, v_ref, mask_ref, o_ref,
                qs_sc, m_sc, l_sc, acc_sc, scale=scale, kv_valid=kv_valid)


def _unmasked_kernel(q_ref, k_ref, v_ref, o_ref,
                     qs_sc, m_sc, l_sc, acc_sc, *, scale, kv_valid):
    _flash_body(q_ref, k_ref, v_ref, None, o_ref,
                qs_sc, m_sc, l_sc, acc_sc, scale=scale, kv_valid=kv_valid)


def _round_up(x, m):
    return ((x + m - 1) // m) * m


def base_attention(q, k, v, mask=None, *, q_tile=256, kv_tile=1024):
    """Pallas TPU implementation of BaseAttention.forward (eval mode)."""
    B, Lq, D = q.shape
    _, Lk, _ = k.shape
    out_dtype = q.dtype
    scale = 1.0 / math.sqrt(D)

    # --- tile selection -----------------------------------------------------
    # q tile: multiple of 8 (sublanes); pad Lq to a tile multiple.
    tq = min(q_tile, _round_up(Lq, 8))
    # Keep both TensorCores busy on v7x: ensure >= 2 (B, q-tile) work items.
    if B * (_round_up(Lq, tq) // tq) < 2:
        half = _round_up(-(-Lq // 2), 8)
        if 8 <= half < tq:
            tq = half
    Lq_pad = _round_up(Lq, tq)

    # kv tile: multiple of 128 (lanes); pad Lk to a tile multiple.
    tk = min(kv_tile, _round_up(Lk, 128))
    # Cap the (tq, tk) fp32 score tile at ~256K elements (vreg/VMEM pressure).
    max_score_elems = 256 * 1024
    if tq * tk > max_score_elems:
        tk = max(128, (max_score_elems // tq) // 128 * 128)
    Lk_pad = _round_up(Lk, tk)
    kv_valid = Lk if Lk_pad != Lk else None

    grid = (B, Lq_pad // tq, Lk_pad // tk)

    # --- operand preparation (bf16 MXU operands, padded to tile multiples) ---
    qb = q.astype(jnp.bfloat16)
    kb = k.astype(jnp.bfloat16)
    vb = v.astype(jnp.bfloat16)
    if Lq_pad != Lq:
        qb = jnp.pad(qb, ((0, 0), (0, Lq_pad - Lq), (0, 0)))
    if Lk_pad != Lk:
        kb = jnp.pad(kb, ((0, 0), (0, Lk_pad - Lk), (0, 0)))
        vb = jnp.pad(vb, ((0, 0), (0, Lk_pad - Lk), (0, 0)))

    q_spec = pl.BlockSpec((1, tq, D), lambda b, i, j: (b, i, 0))
    k_spec = pl.BlockSpec((1, tk, D), lambda b, i, j: (b, j, 0))
    v_spec = pl.BlockSpec((1, tk, D), lambda b, i, j: (b, j, 0))
    o_spec = pl.BlockSpec((1, tq, D), lambda b, i, j: (b, i, 0))

    scratch = [
        pltpu.VMEM((tq, D), jnp.bfloat16),  # scaled bf16 q tile (hoisted)
        pltpu.VMEM((tq, 1), jnp.float32),   # running row max
        pltpu.VMEM((tq, 1), jnp.float32),   # running softmax denom
        pltpu.VMEM((tq, D), jnp.float32),   # fp32 output accumulator
    ]
    cparams = pltpu.CompilerParams(
        dimension_semantics=("parallel", "parallel", "arbitrary"),
        vmem_limit_bytes=32 * 1024 * 1024,  # fits v7x's 64 MiB/TC with headroom
    )
    out_shape = jax.ShapeDtypeStruct((B, Lq_pad, D), out_dtype)

    if mask is None:
        kernel = functools.partial(_unmasked_kernel, scale=scale,
                                   kv_valid=kv_valid)
        out = pl.pallas_call(
            kernel,
            out_shape=out_shape,
            grid_spec=pltpu.PrefetchScalarGridSpec(
                num_scalar_prefetch=0,
                grid=grid,
                in_specs=[q_spec, k_spec, v_spec],
                out_specs=o_spec,
                scratch_shapes=scratch),
            compiler_params=cparams,
        )(qb, kb, vb)
    else:
        # Compact int8 mask in HBM (4x less DMA than fp32); pad with 0
        # (padded kv columns are suppressed in-kernel via kv_valid).
        mask_i8 = mask.astype(jnp.int8)
        if Lq_pad != Lq or Lk_pad != Lk:
            mask_i8 = jnp.pad(mask_i8,
                              ((0, 0), (0, Lq_pad - Lq), (0, Lk_pad - Lk)))
        m_spec = pl.BlockSpec((1, tq, tk), lambda b, i, j: (b, i, j))
        kernel = functools.partial(_masked_kernel, scale=scale,
                                   kv_valid=kv_valid)
        out = pl.pallas_call(
            kernel,
            out_shape=out_shape,
            grid_spec=pltpu.PrefetchScalarGridSpec(
                num_scalar_prefetch=0,
                grid=grid,
                in_specs=[q_spec, k_spec, v_spec, m_spec],
                out_specs=o_spec,
                scratch_shapes=scratch),
            compiler_params=cparams,
        )(qb, kb, vb, mask_i8)

    if Lq_pad != Lq:
        out = out[:, :Lq, :]
    return out


def _reference(q, k, v, mask=None):
    # Pure-JAX reference mirroring the PyTorch forward (dropout in eval = identity).
    x = jnp.matmul(q, jnp.swapaxes(k, -2, -1)) / math.sqrt(k.shape[-1])
    if mask is not None:
        x = x + mask.astype(x.dtype) * (-10000.0)
    x = jax.nn.softmax(x, axis=-1)
    return jnp.matmul(x, v)


if __name__ == "__main__":
    key = jax.random.PRNGKey(0)
    kq, kk, kv_key, km = jax.random.split(key, 4)

    # Small shapes consistent with the module interface.
    B, Lq, Lk, D = 2, 8, 8, 32
    q = jax.random.normal(kq, (B, Lq, D), dtype=jnp.float32)
    k = jax.random.normal(kk, (B, Lk, D), dtype=jnp.float32)
    v = jax.random.normal(kv_key, (B, Lk, D), dtype=jnp.float32)
    # bool mask, True = masked-out position (reference adds mask * -10000).
    mask = jax.random.bernoulli(km, p=0.25, shape=(B, Lq, Lk))

    out = jax.block_until_ready(base_attention(q, k, v, mask))
    ref = _reference(q, k, v, mask)
    assert out.shape == (B, Lq, D)
    # Tolerance covers the bf16 MXU operands.
    assert jnp.allclose(out, ref, atol=1e-2, rtol=1e-2), (
        float(jnp.max(jnp.abs(out - ref))))

    # No-mask specialization.
    out_nm = jax.block_until_ready(base_attention(q, k, v, None))
    ref_nm = _reference(q, k, v, None)
    assert jnp.allclose(out_nm, ref_nm, atol=1e-2, rtol=1e-2), (
        float(jnp.max(jnp.abs(out_nm - ref_nm))))

    # Tiled online-softmax path (multiple q and kv tiles).
    B2, L2, D2 = 2, 256, 64
    k2a, k2b, k2c, k2d = jax.random.split(jax.random.PRNGKey(0), 4)
    q2 = jax.random.normal(k2a, (B2, L2, D2), dtype=jnp.float32)
    k2 = jax.random.normal(k2b, (B2, L2, D2), dtype=jnp.float32)
    v2 = jax.random.normal(k2c, (B2, L2, D2), dtype=jnp.float32)
    m2 = jax.random.bernoulli(k2d, p=0.25, shape=(B2, L2, L2))
    out2 = jax.block_until_ready(
        base_attention(q2, k2, v2, m2, q_tile=128, kv_tile=128))
    ref2 = _reference(q2, k2, v2, m2)
    assert jnp.allclose(out2, ref2, atol=1e-2, rtol=1e-2), (
        float(jnp.max(jnp.abs(out2 - ref2))))

    # Awkward (non-tile-multiple) lengths exercise the padding + tail-mask path.
    B3, Lq3, Lk3, D3 = 1, 100, 200, 32
    k3a, k3b, k3c, k3d = jax.random.split(jax.random.PRNGKey(1), 4)
    q3 = jax.random.normal(k3a, (B3, Lq3, D3), dtype=jnp.float32)
    k3 = jax.random.normal(k3b, (B3, Lk3, D3), dtype=jnp.float32)
    v3 = jax.random.normal(k3c, (B3, Lk3, D3), dtype=jnp.float32)
    m3 = jax.random.bernoulli(k3d, p=0.25, shape=(B3, Lq3, Lk3))
    out3 = jax.block_until_ready(base_attention(q3, k3, v3, m3))
    ref3 = _reference(q3, k3, v3, m3)
    assert out3.shape == (B3, Lq3, D3)
    assert jnp.allclose(out3, ref3, atol=1e-2, rtol=1e-2), (
        float(jnp.max(jnp.abs(out3 - ref3))))
    out3n = jax.block_until_ready(base_attention(q3, k3, v3, None))
    ref3n = _reference(q3, k3, v3, None)
    assert jnp.allclose(out3n, ref3n, atol=1e-2, rtol=1e-2), (
        float(jnp.max(jnp.abs(out3n - ref3n))))

    print("KERNEL_OK")
</pallas_src>

<mosaic_0001>
module attributes {stable_mosaic.version = 11 : i64} {
  func.func @_masked_kernel(%arg0: i32, %arg1: i32, %arg2: i32, %arg3: memref<1x8x32xbf16, #tpu.memory_space<vmem>>, %arg4: memref<1x128x32xbf16, #tpu.memory_space<vmem>>, %arg5: memref<1x128x32xbf16, #tpu.memory_space<vmem>>, %arg6: memref<1x8x128xi8, #tpu.memory_space<vmem>>, %arg7: memref<1x8x32xf32, #tpu.memory_space<vmem>>, %arg8: memref<8x32xbf16, #tpu.memory_space<vmem>>, %arg9: memref<8x1xf32, #tpu.memory_space<vmem>>, %arg10: memref<8x1xf32, #tpu.memory_space<vmem>>, %arg11: memref<8x32xf32, #tpu.memory_space<vmem>>) attributes {dimension_semantics = [#tpu.dimension_semantics<parallel>, #tpu.dimension_semantics<parallel>, #tpu.dimension_semantics<arbitrary>], iteration_bounds = array<i64: 2, 1, 1>, scalar_prefetch = 0 : i64, scratch_operands = 4 : i64, tpu.core_type = #tpu.core_type<tc>, window_params = [{transform_indices = @transform_0, window_bounds = array<i64: 1, 8, 32>}, {transform_indices = @transform_1, window_bounds = array<i64: 1, 128, 32>}, {transform_indices = @transform_2, window_bounds = array<i64: 1, 128, 32>}, {transform_indices = @transform_3, window_bounds = array<i64: 1, 8, 128>}, {transform_indices = @transform_4, window_bounds = array<i64: 1, 8, 32>}]} {
    %c0_i32 = arith.constant 0 : i32
    %0 = arith.cmpi eq, %arg2, %c0_i32 : i32
    %1 = arith.extui %0 : i1 to i32
    %c0_i32_0 = arith.constant 0 : i32
    %2 = arith.cmpi ne, %1, %c0_i32_0 : i32
    scf.if %2 {
      %c0_30 = arith.constant 0 : index
      %c0_31 = arith.constant 0 : index
      %c0_32 = arith.constant 0 : index
      %50 = vector.load %arg3[%c0_30, %c0_31, %c0_32] : memref<1x8x32xbf16, #tpu.memory_space<vmem>>, vector<1x8x32xbf16>
      %51 = vector.shape_cast %50 : vector<1x8x32xbf16> to vector<8x32xbf16>
      %52 = arith.extf %51 : vector<8x32xbf16> to vector<8x32xf32>
      %cst_33 = arith.constant 0.176776692 : f32
      %53 = vector.broadcast %cst_33 : f32 to vector<8x32xf32>
      %54 = arith.mulf %52, %53 : vector<8x32xf32>
      %55 = arith.truncf %54 : vector<8x32xf32> to vector<8x32xbf16>
      %c0_34 = arith.constant 0 : index
      %c0_35 = arith.constant 0 : index
      %56 = vector.load %arg8[%c0_34, %c0_35] : memref<8x32xbf16, #tpu.memory_space<vmem>>, vector<8x32xbf16>
      tpu.vector_store %arg8[%c0_34, %c0_35], %55 {strides = array<i32>} : memref<8x32xbf16, #tpu.memory_space<vmem>>, vector<8x32xbf16>,
      %cst_36 = arith.constant 0xFF800000 : f32
      %57 = vector.broadcast %cst_36 : f32 to vector<8x1xf32>
      %c0_37 = arith.constant 0 : index
      %c0_38 = arith.constant 0 : index
      %58 = vector.load %arg9[%c0_37, %c0_38] : memref<8x1xf32, #tpu.memory_space<vmem>>, vector<8x1xf32>
      tpu.vector_store %arg9[%c0_37, %c0_38], %57 {strides = array<i32>} : memref<8x1xf32, #tpu.memory_space<vmem>>, vector<8x1xf32>,
      %cst_39 = arith.constant 0.000000e+00 : f32
      %59 = vector.broadcast %cst_39 : f32 to vector<8x1xf32>
      %c0_40 = arith.constant 0 : index
      %c0_41 = arith.constant 0 : index
      %60 = vector.load %arg10[%c0_40, %c0_41] : memref<8x1xf32, #tpu.memory_space<vmem>>, vector<8x1xf32>
      tpu.vector_store %arg10[%c0_40, %c0_41], %59 {strides = array<i32>} : memref<8x1xf32, #tpu.memory_space<vmem>>, vector<8x1xf32>,
      %cst_42 = arith.constant 0.000000e+00 : f32
      %61 = vector.broadcast %cst_42 : f32 to vector<8x32xf32>
      %c0_43 = arith.constant 0 : index
      %c0_44 = arith.constant 0 : index
      %62 = vector.load %arg11[%c0_43, %c0_44] : memref<8x32xf32, #tpu.memory_space<vmem>>, vector<8x32xf32>
      tpu.vector_store %arg11[%c0_43, %c0_44], %61 {strides = array<i32>} : memref<8x32xf32, #tpu.memory_space<vmem>>, vector<8x32xf32>,
    } else {
    }
    %c0 = arith.constant 0 : index
    %c0_1 = arith.constant 0 : index
    %c0_2 = arith.constant 0 : index
    %3 = vector.load %arg4[%c0, %c0_1, %c0_2] : memref<1x128x32xbf16, #tpu.memory_space<vmem>>, vector<1x128x32xbf16>
    %4 = vector.shape_cast %3 : vector<1x128x32xbf16> to vector<128x32xbf16>
    %c0_3 = arith.constant 0 : index
    %c0_4 = arith.constant 0 : index
    %c0_5 = arith.constant 0 : index
    %5 = vector.load %arg5[%c0_3, %c0_4, %c0_5] : memref<1x128x32xbf16, #tpu.memory_space<vmem>>, vector<1x128x32xbf16>
    %6 = vector.shape_cast %5 : vector<1x128x32xbf16> to vector<128x32xbf16>
    %c0_6 = arith.constant 0 : index
    %c0_7 = arith.constant 0 : index
    %7 = vector.load %arg8[%c0_6, %c0_7] : memref<8x32xbf16, #tpu.memory_space<vmem>>, vector<8x32xbf16>
    %cst = arith.constant dense<0.000000e+00> : vector<8x128xf32>
    %8 = tpu.matmul %7, %4, %cst {dimension_numbers = #tpu.dot_dimension_numbers<[1], [1], [0], [0], [0, 0, 1, 0], [], []>} : vector<8x32xbf16>, vector<128x32xbf16>, vector<8x128xf32> -> vector<8x128xf32>
    %c0_8 = arith.constant 0 : index
    %c0_9 = arith.constant 0 : index
    %c0_10 = arith.constant 0 : index
    %9 = vector.load %arg6[%c0_8, %c0_9, %c0_10] : memref<1x8x128xi8, #tpu.memory_space<vmem>>, vector<1x8x128xi8>
    %10 = vector.shape_cast %9 : vector<1x8x128xi8> to vector<8x128xi8>
    %c0_i8 = arith.constant 0 : i8
    %11 = vector.broadcast %c0_i8 : i8 to vector<8x128xi8>
    %12 = arith.cmpi ne, %10, %11 : vector<8x128xi8>
    %cst_11 = arith.constant 1.000000e+04 : f32
    %13 = vector.broadcast %cst_11 : f32 to vector<8x128xf32>
    %14 = arith.subf %8, %13 : vector<8x128xf32>
    %15 = arith.select %12, %14, %8 : vector<8x128xi1>, vector<8x128xf32>
    %c128_i32 = arith.constant 128 : i32
    %16 = arith.muli %arg2, %c128_i32 : i32
    %17 = tpu.iota {dimensions = array<i32: 1>} : vector<8x128xi32>
    %18 = vector.broadcast %16 : i32 to vector<8x128xi32>
    %19 = arith.addi %18, %17 : vector<8x128xi32>
    %c8_i32 = arith.constant 8 : i32
    %20 = vector.broadcast %c8_i32 : i32 to vector<8x128xi32>
    %21 = arith.cmpi slt, %19, %20 : vector<8x128xi32>
    %cst_12 = arith.constant -1.000000e+30 : f32
    %22 = vector.broadcast %cst_12 : f32 to vector<8x128xf32>
    %23 = arith.select %21, %15, %22 : vector<8x128xi1>, vector<8x128xf32>
    %c0_13 = arith.constant 0 : index
    %c0_14 = arith.constant 0 : index
    %24 = vector.load %arg9[%c0_13, %c0_14] : memref<8x1xf32, #tpu.memory_space<vmem>>, vector<8x1xf32>
    %cst_15 = arith.constant dense<0xFF800000> : vector<8xf32>
    %25 = vector.multi_reduction <maximumf>, %23, %cst_15 [1] : vector<8x128xf32> to vector<8xf32>
    %26 = vector.shape_cast %25 : vector<8xf32> to vector<8x1xf32>
    %27 = arith.maximumf %24, %26 : vector<8x1xf32>
    %28 = arith.subf %24, %27 : vector<8x1xf32>
    %29 = math.exp %28 : vector<8x1xf32>
    %30 = vector.broadcast %27 : vector<8x1xf32> to vector<8x128xf32>
    %31 = arith.subf %23, %30 : vector<8x128xf32>
    %32 = math.exp %31 : vector<8x128xf32>
    %c0_16 = arith.constant 0 : index
    %c0_17 = arith.constant 0 : index
    %33 = vector.load %arg10[%c0_16, %c0_17] : memref<8x1xf32, #tpu.memory_space<vmem>>, vector<8x1xf32>
    %34 = arith.mulf %29, %33 : vector<8x1xf32>
    %cst_18 = arith.constant dense<0.000000e+00> : vector<8xf32>
    %35 = vector.multi_reduction <add>, %32, %cst_18 [1] : vector<8x128xf32> to vector<8xf32>
    %36 = vector.shape_cast %35 : vector<8xf32> to vector<8x1xf32>
    %37 = arith.addf %34, %36 : vector<8x1xf32>
    %c0_19 = arith.constant 0 : index
    %c0_20 = arith.constant 0 : index
    %38 = vector.load %arg10[%c0_19, %c0_20] : memref<8x1xf32, #tpu.memory_space<vmem>>, vector<8x1xf32>
    tpu.vector_store %arg10[%c0_19, %c0_20], %37 {strides = array<i32>} : memref<8x1xf32, #tpu.memory_space<vmem>>, vector<8x1xf32>,
    %c0_21 = arith.constant 0 : index
    %c0_22 = arith.constant 0 : index
    %39 = vector.load %arg11[%c0_21, %c0_22] : memref<8x32xf32, #tpu.memory_space<vmem>>, vector<8x32xf32>
    %40 = vector.broadcast %29 : vector<8x1xf32> to vector<8x32xf32>
    %41 = arith.mulf %40, %39 : vector<8x32xf32>
    %42 = arith.truncf %32 : vector<8x128xf32> to vector<8x128xbf16>
    %cst_23 = arith.constant dense<0.000000e+00> : vector<8x32xf32>
    %43 = tpu.matmul %42, %6, %cst_23 {dimension_numbers = #tpu.dot_dimension_numbers<[1], [0], [0], [1], [0, 0, 1, 1], [], []>} : vector<8x128xbf16>, vector<128x32xbf16>, vector<8x32xf32> -> vector<8x32xf32>
    %44 = arith.addf %41, %43 : vector<8x32xf32>
    %c0_24 = arith.constant 0 : index
    %c0_25 = arith.constant 0 : index
    %45 = vector.load %arg11[%c0_24, %c0_25] : memref<8x32xf32, #tpu.memory_space<vmem>>, vector<8x32xf32>
    tpu.vector_store %arg11[%c0_24, %c0_25], %44 {strides = array<i32>} : memref<8x32xf32, #tpu.memory_space<vmem>>, vector<8x32xf32>,
    %c0_26 = arith.constant 0 : index
    %c0_27 = arith.constant 0 : index
    %46 = vector.load %arg9[%c0_26, %c0_27] : memref<8x1xf32, #tpu.memory_space<vmem>>, vector<8x1xf32>
    tpu.vector_store %arg9[%c0_26, %c0_27], %27 {strides = array<i32>} : memref<8x1xf32, #tpu.memory_space<vmem>>, vector<8x1xf32>,
    %c0_i32_28 = arith.constant 0 : i32
    %47 = arith.cmpi eq, %arg2, %c0_i32_28 : i32
    %48 = arith.extui %47 : i1 to i32
    %c0_i32_29 = arith.constant 0 : i32
    %49 = arith.cmpi ne, %48, %c0_i32_29 : i32
    scf.if %49 {
      %c0_30 = arith.constant 0 : index
      %c0_31 = arith.constant 0 : index
      %50 = vector.load %arg10[%c0_30, %c0_31] : memref<8x1xf32, #tpu.memory_space<vmem>>, vector<8x1xf32>
      %51 = tpu.reciprocal %50 : vector<8x1xf32> -> vector<8x1xf32>
      %c0_32 = arith.constant 0 : index
      %c0_33 = arith.constant 0 : index
      %52 = vector.load %arg11[%c0_32, %c0_33] : memref<8x32xf32, #tpu.memory_space<vmem>>, vector<8x32xf32>
      %53 = vector.broadcast %51 : vector<8x1xf32> to vector<8x32xf32>
      %54 = arith.mulf %52, %53 : vector<8x32xf32>
      %c0_34 = arith.constant 0 : index
      %c0_35 = arith.constant 0 : index
      %c0_36 = arith.constant 0 : index
      %55 = vector.load %arg7[%c0_34, %c0_35, %c0_36] : memref<1x8x32xf32, #tpu.memory_space<vmem>>, vector<1x8x32xf32>
      %56 = vector.shape_cast %55 : vector<1x8x32xf32> to vector<8x32xf32>
      %57 = vector.shape_cast %54 : vector<8x32xf32> to vector<1x8x32xf32>
      tpu.vector_store %arg7[%c0_34, %c0_35, %c0_36], %57 {strides = array<i32>} : memref<1x8x32xf32, #tpu.memory_space<vmem>>, vector<1x8x32xf32>,
    } else {
    }
    return
  }
  func.func @transform_0(%arg0: i32, %arg1: i32, %arg2: i32) -> (i32, i32, i32) {
    %c0_i32 = arith.constant 0 : i32
    %c0_i32_0 = arith.constant 0 : i32
    return %arg0, %arg1, %c0_i32 : i32, i32, i32
  }
  func.func @transform_1(%arg0: i32, %arg1: i32, %arg2: i32) -> (i32, i32, i32) {
    %c0_i32 = arith.constant 0 : i32
    %c0_i32_0 = arith.constant 0 : i32
    return %arg0, %arg2, %c0_i32 : i32, i32, i32
  }
  func.func @transform_2(%arg0: i32, %arg1: i32, %arg2: i32) -> (i32, i32, i32) {
    %c0_i32 = arith.constant 0 : i32
    %c0_i32_0 = arith.constant 0 : i32
    return %arg0, %arg2, %c0_i32 : i32, i32, i32
  }
  func.func @transform_3(%arg0: i32, %arg1: i32, %arg2: i32) -> (i32, i32, i32) {
    %c0_i32 = arith.constant 0 : i32
    return %arg0, %arg1, %arg2 : i32, i32, i32
  }
  func.func @transform_4(%arg0: i32, %arg1: i32, %arg2: i32) -> (i32, i32, i32) {
    %c0_i32 = arith.constant 0 : i32
    %c0_i32_0 = arith.constant 0 : i32
    return %arg0, %arg1, %c0_i32 : i32, i32, i32
  }
}

</mosaic_0001>

<bundles_post_ra>
// kernel: tpu_custom_call.1
= control target key start
LH: loop header
LB: loop body
LE: loop exit
PB: predicated region body
PF: predicated region fallthrough
CT: control target
= control target key end

     0   :  { %9 = vsyncpa [#allocation7], 0  ;;  %s1249_s0 = inlined_call_operand.vmem [shape: bf16[2,8,32], index: 0, kind: input, shape index: {}]   ;;  %s1250_s1 = inlined_call_operand.vmem [shape: bf16[2,128,32], index: 1, kind: input, shape index: {}]   ;;  %s1251_s2 = inlined_call_operand.vmem [shape: bf16[2,128,32], index: 2, kind: input, shape index: {}]   ;;  %s1252_s3 = inlined_call_operand.vmem [shape: s8[2,8,128], index: 3, kind: input, shape index: {}]   ;;  %s1253_s4 = inlined_call_operand.hbm [shape: f32[2,8,32], index: 4, kind: output, shape index: {}]  }
   0x1   :  { %11 = vsyncpa [#allocation7 + $0x1], 0  ;;  %s1073_s15 = smov 0   ;;  %s1075_s16 = smov 0  }
   0x2   :  { %s1077_s17 = smov 0   ;;  %s1079_s18 = smov 0  }
   0x3   :  { %s1081_s19 = smov 0   ;;  %s1083_s20 = smov 0  }
   0x4 LB: > { %s786_s21 = sadd.s32 4294967295, %s1041_s20   ;;  %s787_s22 = sadd.s32 4294967294, %s1041_s20   ;;  %s1041_s20 = sphi %s1083_s20, %s17_s20   ;;  %s1037_s19 = sphi %s1081_s19, %s1260_s19   ;;  %s1033_s18 = sphi %s1079_s18, %s1259_s18   ;;  %s1029_s17 = sphi %s1077_s17, %s1258_s17   ;;  %s1025_s16 = sphi %s1075_s16, %s1257_s16   ;;  %s1021_s15 = sphi %s1073_s15, %s1256_s15  }
   0x5   : > { %s36_s23 = sadd.s32 1, %s1037_s19  ;;  %s159_s24 = sadd.s32 1, %s1029_s17 }
   0x6   : > { %p38_p0 = scmp.ge.s32.totalorder %s36_s23, 2  ;;  %p169_p1 = scmp.ne.s32.totalorder %s1029_s17, %s1025_s16 }
   0x7   : > { %p170_p2 = scmp.eq.s32.totalorder %s786_s21, 1  ;;  %p175_p3 = scmp.ne.s32.totalorder %s1025_s16, %s1021_s15 }
   0x8   : > { %s1262_s23 = smov (%p38_p0, %s36_s23), 0  ;;  %p176_p5 = scmp.eq.s32.totalorder %s787_s22, 1 }
   0x9   : > { %p1113_p4 = por %p170_p2, %p169_p1  ;;  %s154_s26 = ssub.s32 %s1037_s19, %s1262_s23 }
   0xa   : > { %p790_p6 = scmp.ge.s32.totalorder %s1041_s20, 1  ;;  %p157_p7 = scmp.eq.s32.totalorder %s154_s26, 0 }
   0xb   : > { %p1120_p8 = por %p176_p5, %p175_p3  ;;  %p243_p9 = scmp.lt.s32.totalorder %s1041_s20, 3 }
   0xc   : > { %s1126_s28 = scalar_select %p157_p7, %s1029_s17, %s159_s24  }
   0xd   : > { %p244_p10 = pnand %p790_p6, %p243_p9 }
   0xe   : > { %p299_p11 = scmp.lt.s32.totalorder (!%p244_p10), %s1033_s18, 1  ;;  %vm352_vm0 = vcmask (!%p244_p10), 261120   ;;  %v1043_v0 = vmov (!%p244_p10), 0.0   ;;  %vm1044_vm1 = vmmov (!%p244_p10), 0   ;;  %vm347_vm2 = vcmask (!%p244_p10), 257024   ;;  %s817_s5 = sshll.u32 (!%p244_p10), %s1033_s18, 7 }
   0xf   : > { %247 = sbr.rel (%p244_p10) target bundleno = 901 (0x385), region = 36  ;;  %840 = vmatprep.subr.bf16.mxu0 (!%p244_p10), %v1043_v0  ;;  %353 = vst.msk [vmem:[#allocation5] sm:$0xff] (!%p244_p10), %vm352_vm0, %v1043_v0  ;;  %856 = vmatprep.mubr.msk.bf16.mxu0 (!%p244_p10), %vm1044_vm1, %v1043_v0  ;;  %v1045_v22 = vmov (!%p244_p10), 0   ;;  %vm349_vm3 = vcmask (!%p244_p10), 7168   ;;  %v1046_v23 = vmov (!%p244_p10), -inf   ;;  %v503_v26 = vlaneseq (!%p244_p10)  ;;  %s1201_s10 = scalar_lea.hbm (!%p244_p10), %s1253_s4, %s817_s5 }
  0x10   : > { %860 = vmatprep.subr.bf16.mxu1 (!%p244_p10), %v1043_v0  ;;  %876 = vmatprep.mubr.msk.bf16.mxu1 (!%p244_p10), %vm1044_vm1, %v1043_v0  ;;  %350 = vst.msk [vmem:[#allocation3] sm:$0xff] (!%p244_p10), %vm349_vm3, %v1046_v23  ;;  %351 = vst.msk [vmem:[#allocation4] sm:$0xff] (!%p244_p10), %vm349_vm3, %v1043_v0 }
  0x11   : > { %939 = vset.pattern.permute.xlu0 (!%p244_p10), %v1045_v22  ;;  %940 = vset.pattern.permute.xlu1 (!%p244_p10), %v1045_v22  ;;  %v504_v28 = vand.u32 (!%p244_p10), 127, %v503_v26 }
  0x13   : > { %vm507_vm6 = vcmp.lt.s32.totalorder (!%p244_p10), %v504_v28, 8 }
  0x16   : > { %s1134_s29 = scalar_select %p299_p11, %s1033_s18, 1  ;;  %v531_v61 = vld [vmem:[#allocation5] sm:$0xff] }
  0x17   : > { %v509_v40 = vld [vmem:[#allocation3] sm:$0xff]  ;;  %v524_v55 = vld [vmem:[#allocation4] sm:$0xff]  ;;  %s1047_s18 = smov [#allocation6]  }
  0x18   : > { %s820_s30 = sshll.u32 %s1134_s29, 6  ;;  %s792_s8 = sshll.u32 %s1134_s29, 2 }
  0x19   : > { %s1144_s7 = scalar_lea.vmem %s1250_s1, %s820_s30  ;;  %s305_s11 = scalar_lea.vmem %s1249_s0, %s792_s8 }
  0x1a   : > { %v941_v1 = vld [vmem:[%s1144_s7] sm:$0xff]   ;;  %v942_v3 = vld [vmem:[%s1144_s7 + $0x8] sm:$0xff]   ;;  %v943_v8 = vld [vmem:[%s1144_s7 + $0x10] sm:$0xff]   ;;  %s797_s12 = sshll.u32 %s1134_s29, 1  ;;  %s324_s26 = scalar_lea.vmem %s1251_s2, %s820_s30 }
  0x1b   : > { %v432_v2 = vsel %vm352_vm0, %v941_v1, 0  ;;  %v435_v4 = vsel %vm352_vm0, %v942_v3, 0  ;;  %v343_v5 = vld [vmem:[%s305_s11] sm:$0xf]  ;;  %v438_v10 = vsel %vm352_vm0, %v943_v8, 0  ;;  %v944_v11 = vld [vmem:[%s1144_s7 + $0x18] sm:$0xff]   ;;  %s335_s21 = scalar_lea.vmem %s1252_s3, %s797_s12 }
  0x1c   : > { %841 = vmatpush3.bf16.xpose.msra.mxu0 %v432_v2  ;;  %v344_v6 = vunpack.c.l.bf16 %v343_v5  ;;  %v441_v12 = vsel %vm352_vm0, %v944_v11, 0  ;;  %v945_v13 = vld [vmem:[%s1144_s7 + $0x20] sm:$0xff]   ;;  %v946_v15 = vld [vmem:[%s1144_s7 + $0x28] sm:$0xff]   ;;  %v947_v17 = vld [vmem:[%s1144_s7 + $0x30] sm:$0xff]   ;;  %s296_s29 = sand.u32 1, %s1025_s16   ;;  %s967_s13 = sshll.u32 %s1047_s18, 4  ;;  %s968_s13 = int_to_ptr.vmem [resolvable:$false] %s967_s13 }
  0x1d   : > { %842 = vmatprep.subr.bf16.mxu0 %v1043_v0  ;;  %v444_v14 = vsel %vm352_vm0, %v945_v13, 0  ;;  %v447_v16 = vsel %vm352_vm0, %v946_v15, 0  ;;  %v450_v18 = vsel %vm352_vm0, %v947_v17, 0  ;;  %v948_v19 = vld [vmem:[%s1144_s7 + $0x38] sm:$0xff]   ;;  %v495_v24 = vld [vmem:[%s335_s21] sm:$0x3] }
  0x1e   : > { %v345_v7 = vmul.f32 0.17677669, %v344_v6  ;;  %v453_v20 = vsel %vm352_vm0, %v948_v19, 0  ;;  %vm496_vm4 = vnez %v495_v24  ;;  %v949_v36 = vld [vmem:[%s324_s26] sm:$0xff]   ;;  %v950_v37 = vld [vmem:[%s324_s26 + $0x8] sm:$0xff]   ;;  %v951_v38 = vld [vmem:[%s324_s26 + $0x10] sm:$0xff]  }
  0x1f   : > { %v498_v25 = vsel %vm496_vm4, 16843009, %v1045_v22  ;;  %861 = vmatpush3.bf16.msra.mxu1 %v949_v36  ;;  %v952_v39 = vld [vmem:[%s324_s26 + $0x18] sm:$0xff]   ;;  %v953_v44 = vld [vmem:[%s324_s26 + $0x20] sm:$0xff]   ;;  %v954_v45 = vld [vmem:[%s324_s26 + $0x28] sm:$0xff]   ;;  %s791_s30 = sshll.u32 %s296_s29, 3 }
  0x20   : > { %v346_v9 = vpack.c.bf16 %v345_v7, %v345_v7  ;;  %v499_v27 = vunpack.c.0.s8 %v498_v25  ;;  %862 = vmatprep.subr.bf16.mxu1 %v1043_v0  ;;  %v955_v46 = vld [vmem:[%s324_s26 + $0x30] sm:$0xff]   ;;  %v956_v47 = vld [vmem:[%s324_s26 + $0x38] sm:$0xff]   ;;  %s298_s6 = scalar_lea.vmem [#allocation6], %s791_s30  ;;  %s644_s11 = scalar_lea.sflag [#allocation7], %s296_s29 }
  0x21   : > { %s658_s7 = sshll.u32 %s298_s6, 4  ;;  %s969_s14 = scalar_lea.vmem %s968_s13, 256  ;;  %s1203_s7 = int_to_ptr.vmem [resolvable:$true] %s658_s7 }
  0x22   : > { %348 = vst.msk [vmem:[#allocation2] sm:$0xf] %vm347_vm2, %v346_v9  ;;  %vm500_vm5 = vcmp.ne.s32.totalorder %v499_v27, 0  ;;  %s963_s12 = scalar_lea.vmem %s1203_s7, 128  ;;  %p970_p1 = scmp.lt.s32.totalorder %s1203_s7, %s968_s13 }
  0x23   : > { %863 = vmatpush3.bf16.msra.mxu1 %v950_v37  ;;  %p964_p12 = scmp.ne.s32.totalorder %s1203_s7, %s963_s12  ;;  %p971_p2 = scmp.lt.s32.totalorder %s969_s14, %s963_s12 }
  0x24   : > { %843 = vmatpush3.bf16.xpose.msra.mxu0 %v435_v4  ;;  %864 = vmatprep.subr.bf16.mxu1 %v1043_v0 }
  0x25   : > { %844 = vmatprep.subr.bf16.mxu0 %v1043_v0  ;;  %p965_p13 = pnand %p964_p12, %p1113_p4  ;;  %p972_p3 = por %p971_p2, %p970_p1 }
  0x27   : > { %865 = vmatpush3.bf16.msra.mxu1 %v951_v38  ;;  %p966_p0 = pneg %p965_p13 }
  0x28   : > { %866 = vmatprep.subr.bf16.mxu1 %v1043_v0 }
  0x29   : > { %v386_v21 = vld [vmem:[#allocation2] sm:$0xf]  ;;  %p973_p5 = pnand %p972_p3, %p966_p0 }
  0x2b   : > { %867 = vmatpush3.bf16.msra.mxu1 %v952_v39 }
  0x2c   : > { %845 = vmatpush3.bf16.xpose.msra.mxu0 %v438_v10  ;;  %868 = vmatprep.subr.bf16.mxu1 %v1043_v0 }
  0x2d   : > { %846 = vmatprep.subr.bf16.mxu0 %v1043_v0 }
  0x2f   : > { %869 = vmatpush3.bf16.msra.mxu1 %v953_v44 }
  0x30   : > { %870 = vmatprep.subr.bf16.mxu1 %v1043_v0 }
  0x33   : > { %871 = vmatpush3.bf16.msra.mxu1 %v954_v45 }
  0x34   : > { %847 = vmatpush3.bf16.xpose.msra.mxu0 %v441_v12  ;;  %872 = vmatprep.subr.bf16.mxu1 %v1043_v0 }
  0x35   : > { %848 = vmatprep.subr.bf16.mxu0 %v1043_v0 }
  0x37   : > { %873 = vmatpush3.bf16.msra.mxu1 %v955_v46 }
  0x38   : > { %874 = vmatprep.subr.bf16.mxu1 %v1043_v0 }
  0x3b   : > { %875 = vmatpush3.bf16.msra.mxu1 %v956_v47 }
  0x3c   : > { %849 = vmatpush3.bf16.xpose.msra.mxu0 %v444_v14 }
  0x3d   : > { %850 = vmatprep.subr.bf16.mxu0 %v1043_v0 }
  0x44   : > { %851 = vmatpush3.bf16.xpose.msra.mxu0 %v447_v16 }
  0x45   : > { %852 = vmatprep.subr.bf16.mxu0 %v1043_v0 }
  0x4c   : > { %853 = vmatpush3.bf16.xpose.msra.mxu0 %v450_v18 }
  0x4d   : > { %854 = vmatprep.subr.bf16.mxu0 %v1043_v0 }
  0x54   : > { %855 = vmatpush3.bf16.xpose.msra.mxu0 %v453_v20 }
  0x5b   : > { %857 = vmatmul.mubr.msk.bf16.vlgmr.msra.gmra.mrb[0].mxu0 %vm352_vm0, %v386_v21 }
 0x12e   : > { %v489_v29 = vpop.f32.mrb[0].mxu0 }
 0x12f   : > { %v807_v30 = vadd.f32 -10000.0, %v489_v29  ;;  %v858_v31 = vpop.f32.mrb[1].mxu0 }
 0x130   : > { %v492_v32 = vpop.f32.mrb[2].mxu0 }
 0x131   : > { %v859_v33 = vpop.f32.mrb[3].mxu0  ;;  %v501_v34 = vsel %vm500_vm5, %v807_v30, %v489_v29 }
 0x132   : > { %v508_v35 = vsel %vm507_vm6, %v501_v34, -1e+30 }
 0x133   : > { %510 = vmax.xlane.f32.xlu0 %v508_v35 }
 0x1c0   : > { %v511_v41 = vpop.xlane.xlu0 %510 }
 0x1c1   : > { %v512_v42 = vmax.f32 %v509_v40, %v511_v41 }
 0x1c3   : > { %v513_v43 = vsub.f32 %v509_v40, %v512_v42  ;;  %629 = vst.msk [vmem:[#allocation3] sm:$0xff] %vm349_vm3, %v512_v42  ;;  %518 = vperm.xlu0 %939, %v512_v42  }
 0x1c5   : > { %v514_v53 = vmul.f32 1.442695, %v513_v43 }
 0x242   : > { %v519_v48 = vpop.permute.xlu0 %518 }
 0x243   : > { %v521_v49 = vsub.f32 %v508_v35, %v519_v48 }
 0x245   : > { %v522_v50 = vmul.f32 1.442695, %v521_v49 }
 0x247   : > { %957 = vpow2.f32 %v522_v50 }
 0x248   : > { %959 = vpow2.f32 %v514_v53 }
 0x251   : > { %v958_v51 = vpop.eup %957 }
 0x252   : > { %526 = vadd.xlane.f32.xlu1 %v958_v51  ;;  %v538_v52 = vpack.c.bf16 %v958_v51, %v958_v51  ;;  %v960_v54 = vpop.eup %959 }
 0x253   : > { %v525_v56 = vmul.f32 %v960_v54, %v524_v55 }
 0x254   : > { %877 = vmatmul.mubr.bf16.vlgmr.msra.gmra.mrb[0].mxu1 %v538_v52 }
 0x263   : > { %534 = vperm.xlu1 %940, %v960_v54  }
 0x2df   : > { %v527_v57 = vpop.xlane.xlu1 %526 }
 0x2e0   : > { %v528_v58 = vadd.f32 %v527_v57, %v525_v56 }
 0x2e2   : > { %530 = vst.msk [vmem:[#allocation4] sm:$0xff] %vm349_vm3, %v528_v58 }
 0x2e3   : > { %v535_v62 = vpop.permute.xlu1 %534 }
 0x2e4   : > { %v537_v63 = vmul.f32 %v535_v62, %v531_v61 }
 0x2e9   : > { %v633_v59 = vld [vmem:[#allocation4] sm:$0xff] }
 0x2ea   : > { %961 = vrcp.f32 %v633_v59 }
 0x2f4   : > { %v962_v60 = vpop.eup %961 }
 0x2f5   : > { %638 = vperm.xlu1 %940, %v962_v60  }
 0x327   : > { %v621_v0 = vpop.f32.mrb[0].mxu1 }
 0x328   : > { %v627_v1 = vadd.f32 %v621_v0, %v537_v63  ;;  %v878_v2 = vpop.f32.mrb[1].mxu1 }
 0x329   : > { %v624_v3 = vpop.f32.mrb[2].mxu1 }
 0x32a   : > { %628 = vst.msk [vmem:[#allocation5] sm:$0xff] %vm352_vm0, %v627_v1  ;;  %v879_v4 = vpop.f32.mrb[3].mxu1 }
 0x331   : > { %v635_v5 = vld [vmem:[#allocation5] sm:$0xff] }
 0x374   : > { %v639_v6 = vpop.permute.xlu1 %638 }
 0x375   : > { %v641_v7 = vmul.f32 %v639_v6, %v635_v5 }
 0x377   : > { %642 = vst.msk [vmem:[%s298_s6] sm:$0xff] %vm352_vm0, %v641_v7 }
 0x378   : > { %976 = shalt.err (!%p973_p5)
}
 0x379   : > { %s977_s21 = scalar_lea.hbm %s1201_s10, 128  ;;  %s981_s26 = scalar_lea.hbm %s1253_s4, 256 }
 0x37a   : > { %p978_p6 = scmp.ne.s32.totalorder %s1201_s10, %s977_s21  ;;  %p982_p10 = scmp.lt.u32.totalorder %s1201_s10, %s1253_s4 }
 0x37b   : > { %p983_p11 = scmp.lt.u32.totalorder %s981_s26, %s977_s21  ;;  %p985_p13 = scmp.lt.u32.totalorder %s977_s21, %s1201_s10 }
 0x37c   : > { %p979_p7 = pnand %p978_p6, %p1113_p4 }
 0x37d   : > { %p984_p12 = por %p983_p11, %p982_p10 }
 0x37e   : > { %p980_p9 = pneg %p979_p7 }
 0x37f   : > { %p986_p0 = por %p985_p13, %p984_p12 }
 0x381   : > { %p987_p1 = pnand %p986_p0, %p980_p9 }
 0x383   : > { %990 = shalt.err (!%p987_p1)
}
 0x384   : > { %880 = dma.vmem_to_hbm [thread:$0]  (%p1113_p4), %s1203_s7, 128, %s1201_s10, %s644_s11  }
 0x385 PF: > { %p886_p2 = scmp.ge.s32.totalorder %s1041_s20, 2  ;;  %s670_s5 = sand.u32 1, %s1021_s15  }
 0x386   : > { %s671_s6 = scalar_lea.sflag [#allocation7], %s670_s5 }
 0x387   : > { %p883_p3 = pnand %p886_p2, %p1120_p8 }
 0x389   : > { %1016 = dma.done.wait (!%p883_p3), %s671_s6, 128  }
 0x38a   : > { %1018 = vsyncadd (!%p883_p3), %s671_s6, 4294967168  ;;  %s17_s20 = sadd.s32 1, %s1041_s20   ;;  %s1256_s15 = smov %s1025_s16 }
 0x38b   : > { %p14_p5 = scmp.ge.s32.totalorder %s17_s20, 4   ;;  %s1257_s16 = smov %s1029_s17 }
 0x38c   : > { %s1258_s17 = smov %s1126_s28  ;;  %s1259_s18 = smov %s1037_s19 }
 0x38d   : > { %s1260_s19 = smov %s1262_s23  ;;  %16 = sbr.rel (!%p14_p5) target bundleno = 4 (0x4), region = 88 }
 0x394   :  { %676 = vsyncpa [#allocation7], 1 }
 0x395   :  { %678 = vsyncpa [#allocation7 + $0x1], 1 }

</bundles_post_ra>
